<compile_context>
chip_gen: v7x
topology: tpu7x:2x2x1
jax: 0.10.0
libtpu: 0.0.40
codegen_flags: <defaults>
</compile_context>

<pallas_src>
from collections import defaultdict

import numpy as np
import jax
import jax.numpy as jnp
from jax.experimental import pallas as pl
from jax.experimental.pallas import tpu as pltpu


def _round_up(x, m):
    return ((x + m - 1) // m) * m


_VMEM_LIMIT = 48 * 1024 * 1024   # fits v7x (64 MiB physical); plenty of headroom on v5e/v6e


# ----------------------------------------------------------------------------
# Phase 1: per-relation message matmul  M_r = X[src(r)] @ W_r   (computed once)
# ----------------------------------------------------------------------------
def _msg_kernel(rel_src_ref, x_ref, w_ref, m_ref):
    # x_ref: (1, tk, Fi_pad)  w_ref: (1, Fi_pad, Fo_pad)  m_ref: (1, tk, Fo_pad)
    del rel_src_ref  # only used by the index_map
    m_ref[0] = jnp.dot(x_ref[0], w_ref[0],
                       preferred_element_type=jnp.float32).astype(m_ref.dtype)


def compute_messages(X_by_src, W_stack, rel_src, *, tk, out_dtype):
    """M_stack[r] = X_by_src[rel_src[r]] @ W_stack[r] — one pallas_call for all relations."""
    S, Ns_pad, Fi_pad = X_by_src.shape
    R, _, Fo_pad = W_stack.shape
    grid = (R, Ns_pad // tk)
    return pl.pallas_call(
        _msg_kernel,
        out_shape=jax.ShapeDtypeStruct((R, Ns_pad, Fo_pad), out_dtype),
        grid_spec=pltpu.PrefetchScalarGridSpec(
            num_scalar_prefetch=1,
            grid=grid,
            in_specs=[
                # select the (shared) srctype feature block via the prefetched index
                pl.BlockSpec((1, tk, Fi_pad), lambda r, k, rel_src: (rel_src[r], k, 0)),
                pl.BlockSpec((1, Fi_pad, Fo_pad), lambda r, k, rel_src: (r, 0, 0)),
            ],
            out_specs=pl.BlockSpec((1, tk, Fo_pad), lambda r, k, rel_src: (r, k, 0)),
        ),
        compiler_params=pltpu.CompilerParams(
            dimension_semantics=("parallel", "parallel"),
            vmem_limit_bytes=_VMEM_LIMIT,
        ),
    )(rel_src, X_by_src, W_stack)


# ----------------------------------------------------------------------------
# Phase 2: block-sparse aggregation  h = epilogue( sum over schedule A_tile @ M_tile )
# ----------------------------------------------------------------------------
def _make_agg_kernel(self_loop, use_bias, use_relu):
    def kernel(*refs):
        it = iter(refs)
        nsteps_ref = next(it)                       # (Nd_tiles,)           SMEM
        _r_sched = next(it)                         # used by index_maps    SMEM
        _m_sched = next(it)                         # used by index_maps    SMEM
        _k_sched = next(it)                         # used by index_maps    SMEM
        a_ref = next(it)                            # (1, tm, tk)   bf16
        m_ref = next(it)                            # (1, tk, tn)   bf16
        xd_ref = next(it) if self_loop else None    # (tm, Fi_pad)  bf16
        lw_ref = next(it) if self_loop else None    # (Fi_pad, tn)  bf16
        b_ref = next(it) if use_bias else None      # (1, tn)       f32
        o_ref = next(it)                            # (tm, tn)      f32 output tile

        i = pl.program_id(0)
        s = pl.program_id(2)    # schedule-step axis (reduction)

        # NOTE: the output block index is (i, j) — constant over the step axis — so the
        # f32 output tile stays VMEM-resident across the whole reduction and we can
        # accumulate directly into it (no scratch, single writeback per tile).
        @pl.when(s == 0)
        def _init():
            o_ref[...] = jnp.zeros_like(o_ref)

        # Padding steps of this i-tile's schedule repeat the previous block index (no new
        # DMA); skip their compute here.
        @pl.when(s < nsteps_ref[i])
        def _step():
            o_ref[...] += jnp.dot(a_ref[0], m_ref[0],
                                  preferred_element_type=jnp.float32)

        @pl.when(s == pl.num_programs(2) - 1)
        def _finalize():
            h = o_ref[...]
            if self_loop:
                h = h + jnp.dot(xd_ref[...], lw_ref[...],
                                preferred_element_type=jnp.float32)
            if use_bias:
                h = h + b_ref[...]              # (1, tn) broadcasts over rows
            if use_relu:
                h = jnp.maximum(h, 0.0)
            # TODO(synk): dropout p=0.0 is the identity; nonzero dropout would use
            # pltpu.prng_seed / pltpu.prng_random_bits here.
            o_ref[...] = h

    return kernel


def aggregate_dsttype(schedule, A_stack, M_stack, x_dst, loop_w, bias, *,
                      self_loop, use_bias, use_relu, tm, tn, tk):
    nsteps, r_sched, m_sched, k_sched, max_steps = schedule
    R, Nd_pad, Ns_pad = A_stack.shape
    Fo_pad = M_stack.shape[-1]
    grid = (Nd_pad // tm, Fo_pad // tn, max_steps)

    def a_map(i, j, s, ns, rs, ms, ks):
        t = i * max_steps + s
        return (rs[t], i, ks[t])

    def m_map(i, j, s, ns, rs, ms, ks):
        t = i * max_steps + s
        return (ms[t], ks[t], j)

    in_specs = [pl.BlockSpec((1, tm, tk), a_map),
                pl.BlockSpec((1, tk, tn), m_map)]
    inputs = [A_stack, M_stack]
    if self_loop:
        Fi_pad = x_dst.shape[-1]
        in_specs.append(pl.BlockSpec((tm, Fi_pad), lambda i, j, s, ns, rs, ms, ks: (i, 0)))
        in_specs.append(pl.BlockSpec((Fi_pad, tn), lambda i, j, s, ns, rs, ms, ks: (0, j)))
        inputs += [x_dst, loop_w]
    if use_bias:
        in_specs.append(pl.BlockSpec((1, tn), lambda i, j, s, ns, rs, ms, ks: (0, j)))
        inputs.append(bias)

    kernel = _make_agg_kernel(self_loop, use_bias, use_relu)

    return pl.pallas_call(
        kernel,
        out_shape=jax.ShapeDtypeStruct((Nd_pad, Fo_pad), jnp.float32),
        grid_spec=pltpu.PrefetchScalarGridSpec(
            num_scalar_prefetch=4,
            grid=grid,
            in_specs=in_specs,
            out_specs=pl.BlockSpec((tm, tn), lambda i, j, s, ns, rs, ms, ks: (i, j)),
        ),
        compiler_params=pltpu.CompilerParams(
            dimension_semantics=("parallel", "parallel", "arbitrary"),
            vmem_limit_bytes=_VMEM_LIMIT,
        ),
    )(nsteps, r_sched, m_sched, k_sched, *inputs)


# ----------------------------------------------------------------------------
# Host-side tile schedule: list of nonzero (relation, k) adjacency tiles per i-tile
# ----------------------------------------------------------------------------
def _build_tile_schedule(edges_np, rel_to_m, Nd_tiles, tm, tk):
    per_i = [[] for _ in range(Nd_tiles)]
    for r, (src, dst) in enumerate(edges_np):
        if src.size == 0:
            continue
        pairs = np.unique(np.stack([dst // tm, src // tk], axis=1), axis=0)
        for it, kt in pairs:
            per_i[int(it)].append((r, int(rel_to_m[r]), int(kt)))
    max_steps = max(1, max((len(p) for p in per_i), default=1))
    r_sched = np.zeros((Nd_tiles, max_steps), np.int32)
    m_sched = np.zeros((Nd_tiles, max_steps), np.int32)
    k_sched = np.zeros((Nd_tiles, max_steps), np.int32)
    nsteps = np.zeros((Nd_tiles,), np.int32)
    for it, lst in enumerate(per_i):
        nsteps[it] = len(lst)
        for s_, (r, m_, kt) in enumerate(lst):
            r_sched[it, s_], m_sched[it, s_], k_sched[it, s_] = r, m_, kt
        if lst:
            # padding steps repeat the last active indices -> unchanged block index,
            # Pallas issues no new DMA and the kernel skips the compute.
            r_sched[it, len(lst):] = lst[-1][0]
            m_sched[it, len(lst):] = lst[-1][1]
            k_sched[it, len(lst):] = lst[-1][2]
    return (jnp.asarray(nsteps),
            jnp.asarray(r_sched.reshape(-1)),   # 1D: avoids 2D SMEM padding blow-up
            jnp.asarray(m_sched.reshape(-1)),
            jnp.asarray(k_sched.reshape(-1)),
            int(max_steps))


# ----------------------------------------------------------------------------
# Module wrapper (parameters + graph glue)
# ----------------------------------------------------------------------------
def xavier_uniform(key, shape, gain):
    fan_in, fan_out = shape[-2], shape[-1]
    bound = gain * (6.0 / (fan_in + fan_out)) ** 0.5
    return jax.random.uniform(key, shape, jnp.float32, -bound, bound)


class RelGraphConvLayerPallas:
    def __init__(self, in_feat, out_feat, rel_names, num_bases, *,
                 weight=True, bias=True, activation=True, self_loop=False,
                 key=None, compute_dtype=jnp.bfloat16,
                 tile_m=256, tile_k=512, tile_n=1024):
        self.in_feat = in_feat
        self.out_feat = out_feat
        self.rel_names = list(rel_names)
        self.num_bases = num_bases
        self.use_bias = bias
        self.activation = activation
        self.self_loop = self_loop
        self.use_weight = weight
        self.use_basis = num_bases < len(rel_names) and weight
        self.compute_dtype = compute_dtype
        # tile caps: tm multiple of 16 (bf16 packs 2 rows/sublane), tk/tn multiples of 128
        self.tile_m = _round_up(tile_m, 16)
        self.tile_k = _round_up(tile_k, 128)
        self.tile_n = _round_up(tile_n, 128)

        if not self.use_weight:
            # copy_u path: messages keep in_feat features -> must match out_feat downstream
            assert in_feat == out_feat, "weight=False requires in_feat == out_feat"

        gain = 2.0 ** 0.5  # calculate_gain('relu')
        keys = jax.random.split(key, 4)
        if self.use_weight:
            if self.use_basis:
                # WeightBasis: basis (B, Fin, Fout), coefficients (R, B)
                self.basis = xavier_uniform(keys[0], (num_bases, in_feat, out_feat), gain)
                self.coeff = xavier_uniform(keys[1], (len(rel_names), num_bases), gain)
            else:
                self.weight = xavier_uniform(keys[0], (len(rel_names), in_feat, out_feat), gain)
        if self.use_bias:
            self.h_bias = jnp.zeros((1, out_feat), jnp.float32)
        if self.self_loop:
            self.loop_weight = xavier_uniform(keys[2], (in_feat, out_feat), gain)

    def _relation_weights(self):
        if not self.use_weight:
            return None
        if self.use_basis:
            # TODO(synk): exploit the basis decomposition in phase 1 (X @ basis_b once per
            # srctype, then a coeff axpy) to cut message-matmul work from R to num_bases.
            weight = jnp.einsum("rb,bio->rio", self.coeff, self.basis)
        else:
            weight = self.weight
        return {self.rel_names[i]: weight[i] for i in range(len(self.rel_names))}

    def __call__(self, graph, inputs):
        """graph: dict with
             'canonical_etypes': list of (srctype, etype, dsttype)
             'num_nodes': dict ntype -> int
             'edges': dict canonical_etype -> (src_idx, dst_idx) int32 arrays
           inputs: dict ntype -> [N_ntype, in_feat] float32
        """
        wdict = self._relation_weights()
        cdt = self.compute_dtype
        Fi_pad = _round_up(self.in_feat, 128)
        # single j tile (tn == Fo_pad) whenever Fo fits under the cap -> A streamed once,
        # wide lane-dense output stores
        tn = min(self.tile_n, _round_up(self.out_feat, 128))
        Fo_pad = _round_up(self.out_feat, tn)

        rels_by_dst = defaultdict(list)
        for cet in graph["canonical_etypes"]:
            rels_by_dst[cet[2]].append(cet)

        out = {}
        for dsttype in sorted(rels_by_dst):
            rels = rels_by_dst[dsttype]
            R = len(rels)
            srctypes = sorted({s for (s, _, _) in rels})
            src_index = {st: idx for idx, st in enumerate(srctypes)}
            Nd = graph["num_nodes"][dsttype]
            Ns_max = max(graph["num_nodes"][s] for s in srctypes)

            # ---- tiling ----
            tm = min(self.tile_m, _round_up(Nd, 16))
            # v7x has 2 TensorCores: ensure >= 2 parallel i tiles when possible
            if _round_up(Nd, tm) // tm < 2 and tm >= 32:
                tm = _round_up(tm // 2, 16)
            Nd_pad = _round_up(Nd, tm)
            tk = min(self.tile_k, _round_up(Ns_max, 128))
            Ns_pad = _round_up(Ns_max, tk)

            # ---- dense per-relation adjacency (host-side; graph structure is static) ----
            edges_np = []
            for (s, e, d) in rels:
                src_idx, dst_idx = graph["edges"][(s, e, d)]
                edges_np.append((np.asarray(src_idx), np.asarray(dst_idx)))
            A_np = np.zeros((R, Nd_pad, Ns_pad), np.float32)
            for r, (src, dst) in enumerate(edges_np):
                np.add.at(A_np[r], (dst, src), 1.0)
            assert A_np.max(initial=0.0) <= 256.0, \
                "bf16 adjacency is exact only for edge multiplicity <= 256"
            A_stack = jnp.asarray(A_np, dtype=cdt)
            # TODO(synk): cache A_stack / schedule across forwards for a static graph; use an
            # int8 A + int MXU path on v5e/v6e (v7x MXU is fp8-only); use a CSR/edge-list
            # gather for extremely sparse graphs instead of dense block-sparse tiles.

            # ---- source features stacked once per srctype (not per relation) ----
            feat_dim = Fi_pad if self.use_weight else Fo_pad
            X_list = []
            for st in srctypes:
                Ns = graph["num_nodes"][st]
                Xp = (jnp.zeros((Ns_pad, feat_dim), cdt)
                      .at[:Ns, :self.in_feat].set(inputs[st].astype(cdt)))
                X_list.append(Xp)
            X_by_src = jnp.stack(X_list)
            rel_src = jnp.asarray([src_index[s] for (s, _, _) in rels], jnp.int32)

            # ---- phase 1: messages M_r = X[src(r)] @ W_r, computed once per relation ----
            if self.use_weight:
                W_pad = jnp.zeros((R, Fi_pad, Fo_pad), cdt)
                for ridx, (s, e, d) in enumerate(rels):
                    W_pad = W_pad.at[ridx, :self.in_feat, :self.out_feat].set(
                        wdict[e].astype(cdt))
                M_stack = compute_messages(X_by_src, W_pad, rel_src, tk=tk, out_dtype=cdt)
                rel_to_m = list(range(R))
            else:
                M_stack = X_by_src
                rel_to_m = [src_index[s] for (s, _, _) in rels]

            # ---- block-sparse tile schedule (skip empty adjacency tiles) ----
            schedule = _build_tile_schedule(edges_np, rel_to_m, Nd_pad // tm, tm, tk)

            # ---- epilogue operands ----
            if self.self_loop:
                x_dst = (jnp.zeros((Nd_pad, Fi_pad), cdt)
                         .at[:Nd, :self.in_feat].set(inputs[dsttype].astype(cdt)))
                loop_w = (jnp.zeros((Fi_pad, Fo_pad), cdt)
                          .at[:self.in_feat, :self.out_feat].set(self.loop_weight.astype(cdt)))
            else:
                x_dst = loop_w = None
            if self.use_bias:
                bias = (jnp.zeros((1, Fo_pad), jnp.float32)
                        .at[:, :self.out_feat].set(self.h_bias))
            else:
                bias = None

            # ---- phase 2: fused block-sparse aggregation + epilogue ----
            h_pad = aggregate_dsttype(
                schedule, A_stack, M_stack, x_dst, loop_w, bias,
                self_loop=self.self_loop, use_bias=self.use_bias,
                use_relu=self.activation, tm=tm, tn=tn, tk=tk)
            out[dsttype] = h_pad[:Nd, :self.out_feat]
        return out


# ----------------------------------------------------------------------------
# Pure-JAX f32 reference (mirrors the PyTorch/DGL semantics) for correctness check
# ----------------------------------------------------------------------------
def reference_forward(layer, graph, inputs):
    wdict = layer._relation_weights()
    dsttypes = sorted({d for (_, _, d) in graph["canonical_etypes"]})
    agg = {nt: jnp.zeros((graph["num_nodes"][nt], layer.out_feat), jnp.float32)
           for nt in dsttypes}
    for (s, e, d) in graph["canonical_etypes"]:
        src_idx, dst_idx = graph["edges"][(s, e, d)]
        msgs = inputs[s] @ wdict[e] if layer.use_weight else inputs[s]
        agg[d] = agg[d].at[dst_idx].add(msgs[src_idx])
    out = {}
    for nt in dsttypes:
        h = agg[nt]
        if layer.self_loop:
            h = h + inputs[nt] @ layer.loop_weight
        if layer.use_bias:
            h = h + layer.h_bias
        if layer.activation:
            h = jnp.maximum(h, 0.0)
        out[nt] = h
    return out


# ----------------------------------------------------------------------------
if __name__ == "__main__":
    key = jax.random.PRNGKey(0)
    k_graph, k_feat_u, k_feat_i, k_params = jax.random.split(key, 4)

    in_feat, out_feat = 32, 64
    num_users, num_items = 160, 96
    num_edges = 256
    rel_names = ["follows", "buys", "sold_to"]
    canonical_etypes = [
        ("user", "follows", "user"),
        ("user", "buys", "item"),
        ("item", "sold_to", "user"),
    ]

    # deterministic synthetic heterograph
    ks = jax.random.split(k_graph, 6)
    edges = {
        ("user", "follows", "user"): (
            jax.random.randint(ks[0], (num_edges,), 0, num_users, jnp.int32),
            jax.random.randint(ks[1], (num_edges,), 0, num_users, jnp.int32)),
        ("user", "buys", "item"): (
            jax.random.randint(ks[2], (num_edges,), 0, num_users, jnp.int32),
            jax.random.randint(ks[3], (num_edges,), 0, num_items, jnp.int32)),
        ("item", "sold_to", "user"): (
            jax.random.randint(ks[4], (num_edges,), 0, num_items, jnp.int32),
            jax.random.randint(ks[5], (num_edges,), 0, num_users, jnp.int32)),
    }
    graph = {
        "canonical_etypes": canonical_etypes,
        "num_nodes": {"user": num_users, "item": num_items},
        "edges": edges,
    }
    inputs = {
        "user": jax.random.normal(k_feat_u, (num_users, in_feat), jnp.float32),
        "item": jax.random.normal(k_feat_i, (num_items, in_feat), jnp.float32),
    }

    # Small tile caps here so the multi-tile / multi-relation / block-sparse schedule path
    # is exercised at demo sizes; the class defaults (256/512/1024) are the production choice.
    layer = RelGraphConvLayerPallas(
        in_feat, out_feat, rel_names, num_bases=2,
        weight=True, bias=True, activation=True, self_loop=True, key=k_params,
        tile_m=64, tile_k=128, tile_n=128)

    out = layer(graph, inputs)
    out = {k: jax.block_until_ready(v) for k, v in out.items()}

    ref = reference_forward(layer, graph, inputs)
    for nt in out:
        assert out[nt].shape == (graph["num_nodes"][nt], out_feat)
        assert bool(jnp.all(jnp.isfinite(out[nt])))
        err = float(jnp.max(jnp.abs(out[nt] - ref[nt])))
        scale = float(jnp.max(jnp.abs(ref[nt]))) + 1e-6
        assert err / scale < 0.08, f"{nt}: relative error {err / scale:.4f} too large"
    print("KERNEL_OK")
</pallas_src>

<mosaic_0001>
module attributes {stable_mosaic.version = 11 : i64} {
  func.func @_msg_kernel(%arg0: i32, %arg1: i32, %arg2: memref<1xi32, #tpu.memory_space<smem>>, %arg3: memref<1x128x128xbf16, #tpu.memory_space<vmem>>, %arg4: memref<1x128x128xbf16, #tpu.memory_space<vmem>>, %arg5: memref<1x128x128xbf16, #tpu.memory_space<vmem>>) attributes {dimension_semantics = [#tpu.dimension_semantics<parallel>, #tpu.dimension_semantics<parallel>], iteration_bounds = array<i64: 1, 2>, scalar_prefetch = 1 : i64, scratch_operands = 0 : i64, tpu.core_type = #tpu.core_type<tc>, window_params = [{transform_indices = @transform_0, window_bounds = array<i64: 1, 128, 128>}, {transform_indices = @transform_1, window_bounds = array<i64: 1, 128, 128>}, {transform_indices = @transform_2, window_bounds = array<i64: 1, 128, 128>}]} {
    %c0 = arith.constant 0 : index
    %c0_0 = arith.constant 0 : index
    %c0_1 = arith.constant 0 : index
    %0 = vector.load %arg3[%c0, %c0_0, %c0_1] : memref<1x128x128xbf16, #tpu.memory_space<vmem>>, vector<1x128x128xbf16>
    %1 = vector.shape_cast %0 : vector<1x128x128xbf16> to vector<128x128xbf16>
    %c0_2 = arith.constant 0 : index
    %c0_3 = arith.constant 0 : index
    %c0_4 = arith.constant 0 : index
    %2 = vector.load %arg4[%c0_2, %c0_3, %c0_4] : memref<1x128x128xbf16, #tpu.memory_space<vmem>>, vector<1x128x128xbf16>
    %3 = vector.shape_cast %2 : vector<1x128x128xbf16> to vector<128x128xbf16>
    %cst = arith.constant dense<0.000000e+00> : vector<128x128xf32>
    %4 = tpu.matmul %1, %3, %cst {dimension_numbers = #tpu.dot_dimension_numbers<[1], [0], [0], [1], [0, 0, 1, 1], [], []>} : vector<128x128xbf16>, vector<128x128xbf16>, vector<128x128xf32> -> vector<128x128xf32>
    %5 = arith.truncf %4 : vector<128x128xf32> to vector<128x128xbf16>
    %c0_5 = arith.constant 0 : index
    %c0_6 = arith.constant 0 : index
    %c0_7 = arith.constant 0 : index
    %6 = vector.load %arg5[%c0_5, %c0_6, %c0_7] : memref<1x128x128xbf16, #tpu.memory_space<vmem>>, vector<1x128x128xbf16>
    %7 = vector.shape_cast %6 : vector<1x128x128xbf16> to vector<128x128xbf16>
    %8 = vector.shape_cast %5 : vector<128x128xbf16> to vector<1x128x128xbf16>
    tpu.vector_store %arg5[%c0_5, %c0_6, %c0_7], %8 {strides = array<i32>} : memref<1x128x128xbf16, #tpu.memory_space<vmem>>, vector<1x128x128xbf16>,
    return
  }
  func.func @transform_0(%arg0: i32, %arg1: i32, %arg2: memref<1xi32, #tpu.memory_space<smem>>) -> (i32, i32, i32) {
    %0 = arith.index_cast %arg0 : i32 to index
    %1 = memref.load %arg2[%0] : memref<1xi32, #tpu.memory_space<smem>>
    %c0_i32 = arith.constant 0 : i32
    %c0_i32_0 = arith.constant 0 : i32
    return %1, %arg1, %c0_i32 : i32, i32, i32
  }
  func.func @transform_1(%arg0: i32, %arg1: i32, %arg2: memref<1xi32, #tpu.memory_space<smem>>) -> (i32, i32, i32) {
    %c0_i32 = arith.constant 0 : i32
    %c0_i32_0 = arith.constant 0 : i32
    %c0_i32_1 = arith.constant 0 : i32
    return %arg0, %c0_i32, %c0_i32_0 : i32, i32, i32
  }
  func.func @transform_2(%arg0: i32, %arg1: i32, %arg2: memref<1xi32, #tpu.memory_space<smem>>) -> (i32, i32, i32) {
    %c0_i32 = arith.constant 0 : i32
    %c0_i32_0 = arith.constant 0 : i32
    return %arg0, %arg1, %c0_i32 : i32, i32, i32
  }
}

</mosaic_0001>

<bundles_post_ra>
// kernel: tpu_custom_call.1
= control target key start
LH: loop header
LB: loop body
LE: loop exit
PB: predicated region body
PF: predicated region fallthrough
CT: control target
= control target key end

     0   :  { %s1388_s0 = inlined_call_operand.<no memory space> [shape: s32[1], index: 0, kind: input, shape index: {}]   ;;  %s1389_s1 = inlined_call_operand.hbm [shape: bf16[1,256,128], index: 1, kind: input, shape index: {}]   ;;  %s1390_s2 = inlined_call_operand.hbm [shape: bf16[1,128,128], index: 2, kind: input, shape index: {}]   ;;  %s1391_s3 = inlined_call_operand.hbm [shape: bf16[1,256,128], index: 3, kind: output, shape index: {}]  }
   0x1   :  { %1402 = sst [smem:[#allocation16_spill]] %s1390_s2 }
   0x2   :  { %8 = sst [smem:[#allocation3]] %s1388_s0 }
   0x3   :  { %9 = vsyncpa [#allocation5], 0 }
   0x4   :  { %11 = vsyncpa [#allocation5 + $0x1], 0 }
   0x5   :  { %12 = vsyncpa [#allocation8], 0 }
   0x6   :  { %13 = vsyncpa [#allocation6], 0 }
   0x7   :  { %15 = vsyncpa [#allocation6 + $0x1], 0  ;;  %s1127_s14 = smov 0   ;;  %s1129_s15 = smov 0  }
   0x8   :  { %s1131_s16 = smov 0   ;;  %s1133_s17 = smov 0  }
   0x9   :  { %s1135_s18 = smov 0   ;;  %s1137_s19 = smov 0  }
   0xa   :  { %s1139_s20 = smov 0   ;;  %s1141_s0 = smov 0  }
   0xb   :  { %s1143_s21 = smov 0  }
   0xc LB: > { %1403 = sst [smem:[#allocation13_spill]] %s1063_s14  ;;  %s632_s22 = sadd.s32 4294967295, %s1095_s21   ;;  %s1095_s21 = sphi %s1143_s21, %s21_s21   ;;  %s1091_s0 = sphi %s1141_s0, %s1433_s0   ;;  %s1087_s20 = sphi %s1139_s20, %s1432_s20   ;;  %s1083_s19 = sphi %s1137_s19, %s1431_s19   ;;  %s1079_s18 = sphi %s1135_s18, %s1430_s18   ;;  %s1075_s17 = sphi %s1133_s17, %s1429_s17   ;;  %s1071_s16 = sphi %s1131_s16, %s1428_s16   ;;  %s1067_s15 = sphi %s1129_s15, %s1427_s15   ;;  %s1063_s14 = sphi %s1127_s14, %s1426_s14  }
   0xd   : > { %s633_s23 = sadd.s32 4294967294, %s1095_s21   ;;  %p57_p0 = scmp.ne.s32.totalorder %s1079_s18, %s1075_s17 }
   0xe   : > { %p1173_p1 = scmp.eq.s32.totalorder %s632_s22, 0  ;;  %p108_p2 = scmp.ne.s32.totalorder %s1071_s16, %s1067_s15 }
   0xf   : > { %p109_p3 = scmp.eq.s32.totalorder %s632_s22, 1  ;;  %p114_p5 = scmp.ne.s32.totalorder %s1067_s15, %s1063_s14 }
  0x10   : > { %s1404_s24 = scalar_select %p1173_p1, 1, 0 }
  0x11   : > { %p1181_p4 = por %p1173_p1, %p57_p0  ;;  %p1187_p6 = por %p109_p3, %p108_p2 }
  0x12   : > { %p115_p7 = scmp.eq.s32.totalorder %s633_s23, 1  ;;  %p634_p8 = scmp.ge.s32.totalorder %s1095_s21, 1 }
  0x13   : > { %s1405_s25 = scalar_select %p1181_p4, 1, 0 }
  0x14   : > { %s1406_s26 = scalar_select %p1187_p6, 1, 0 }
  0x15   : > { %p122_p9 = scmp.lt.s32.totalorder %s1095_s21, 3  ;;  %p1193_p10 = por %p115_p7, %p114_p5 }
  0x16   : > { %s1097_s29 = smov [#allocation7]   ;;  %s1411_s2 = sld [smem:[#allocation16_spill]] }
  0x17   : > { %s1407_s27 = scalar_select %p1193_p10, 1, 0 }
  0x18   : > { %p1197_p11 = pnand %p634_p8, %p122_p9  ;;  %s137_s30 = sshll.u32 %s1097_s29, 4  ;;  %s138_s30 = int_to_ptr.vmem [resolvable:$true] %s137_s30 }
  0x19   : > { %1408 = sst [smem:[#allocation14_spill]] %s1407_s27 }
  0x1a   : > { %s1409_s28 = scalar_select %p1197_p11, 1, 0 }
  0x1b   : > { %p818_p12 = pneg %p1197_p11 }
  0x1c   : > { %s927_s7 = scalar_lea.hbm %s1411_s2, 1024 }
  0x1d   : > { %p1206_p0 = pnand %p818_p12, %p1173_p1  ;;  %p928_p2 = scmp.ne.s32.totalorder %s1411_s2, %s927_s7 }
  0x1e   : > { %p934_p8 = scmp.lt.u32.totalorder %s927_s7, %s1411_s2 }
  0x1f   : > { %p929_p3 = pneg %p1206_p0 }
  0x21   : > { %p930_p5 = pnand %p929_p3, %p928_p2 }
  0x23   : > { %p931_p7 = pneg %p930_p5 }
  0x25   : > { %p936_p9 = pnand %p934_p8, %p931_p7 }
  0x27   : > { %939 = shalt.err (!%p936_p9)
}
  0x28   : > { %s940_s12 = scalar_lea.vmem %s138_s30, 1024  ;;  %p948_p6 = scmp.lt.s32.totalorder %s138_s30, %s138_s30 }
  0x29   : > { %p941_p12 = scmp.ne.s32.totalorder %s138_s30, %s940_s12  ;;  %p949_p1 = scmp.lt.s32.totalorder %s940_s12, %s940_s12 }
  0x2b   : > { %p943_p13 = pnand %p941_p12, %p929_p3  ;;  %p950_p4 = por %p949_p1, %p948_p6 }
  0x2d   : > { %p944_p10 = pneg %p943_p13 }
  0x2f   : > { %p951_p11 = pnand %p950_p4, %p944_p10 }
  0x31   : > { %954 = shalt.err (!%p951_p11)
}
  0x32   : > { %s1397_s13 = smov 64   ;;  %s1398_s17 = smov 4  }
  0x33   : > { %821 = dma.hbm_to_vmem [thread:$0]  (!%p1206_p0), %s1411_s2, 1024, %s138_s30, [#allocation8], %s1397_s13, %s1397_s13, %s1398_s17  }
  0x34   : > { %s30_s29 = sadd.s32 1, %s1091_s0  ;;  %s37_s5 = sld [smem:[#allocation3]] }
  0x35   : > { %p31_p1 = scmp.ge.s32.totalorder %s30_s29, 2  ;;  %s44_s6 = sadd.s32 1, %s1083_s19 }
  0x36   : > { %p51_p4 = scmp.ne.s32.totalorder %s1083_s19, %s1079_s18  ;;  %p52_p6 = scmp.eq.s32.totalorder %s1095_s21, 0 }
  0x37   : > { %s1435_s29 = smov (%p31_p1, %s30_s29), 0  ;;  %s98_s7 = sadd.s32 1, %s1071_s16 }
  0x38   : > { %1412 = sst [smem:[#allocation15_spill]] %s1435_s29  ;;  %p1236_p10 = por %p52_p6, %p51_p4 }
  0x39   : > { %s40_s8 = ssub.s32 %s1091_s0, %s1435_s29  ;;  %p831_p11 = scmp.lt.s32.totalorder %s1095_s21, 2 }
  0x3a   : > { %p96_p13 = scmp.eq.s32.totalorder %s40_s8, 0  ;;  %s151_s30 = sand.u32 1, %s1083_s19  }
  0x3b   : > { %s637_s11 = sshll.u32 %s151_s30, 6  ;;  %s638_s12 = sshll.u32 %s1091_s0, 4 }
  0x3c   : > { %s1246_s9 = scalar_select %p96_p13, %s1071_s16, %s98_s7  }
  0x3d   : > { %s1249_s10 = scalar_select %p96_p13, %s1083_s19, %s44_s6  }
  0x3e   : > { %s639_s22 = sshll.u32 %s37_s5, 5  ;;  %s155_s13 = scalar_lea.vmem [#allocation4], %s637_s11 }
  0x3f   : > { %s162_s23 = sadd.s32 %s639_s22, %s638_s12  ;;  %s165_s17 = sshll.u32 %s155_s13, 4  ;;  %s1252_s17 = int_to_ptr.vmem [resolvable:$true] %s165_s17 }
  0x40   : > { %s640_s2 = sshll.u32 %s162_s23, 6  ;;  %p1263_p0 = pnand %p831_p11, %p1236_p10 }
  0x41   : > { %s1257_s29 = scalar_lea.hbm %s1389_s1, %s640_s2  ;;  %s1267_s13 = scalar_lea.sflag [#allocation5], %s151_s30 }
  0x42   : > { %s955_s5 = scalar_lea.hbm %s1257_s29, 1024  ;;  %p957_p3 = pneg %p1263_p0 }
  0x43   : > { %p956_p2 = scmp.ne.s32.totalorder %s1257_s29, %s955_s5  ;;  %s960_s27 = scalar_lea.hbm %s1389_s1, 2048 }
  0x44   : > { %p961_p8 = scmp.lt.u32.totalorder %s1257_s29, %s1389_s1  ;;  %p962_p9 = scmp.lt.u32.totalorder %s960_s27, %s955_s5 }
  0x45   : > { %p958_p5 = pnand %p957_p3, %p956_p2  ;;  %p964_p1 = scmp.lt.u32.totalorder %s955_s5, %s1257_s29 }
  0x46   : > { %p963_p12 = por %p962_p9, %p961_p8 }
  0x47   : > { %p959_p7 = pneg %p958_p5 }
  0x48   : > { %p965_p4 = por %p964_p1, %p963_p12 }
  0x4a   : > { %p966_p6 = pnand %p965_p4, %p959_p7 }
  0x4c   : > { %969 = shalt.err (!%p966_p6)
}
  0x4d   : > { %s970_s8 = scalar_lea.vmem %s1252_s17, 1024  ;;  %s1100_s30 = smov [#allocation4]  }
  0x4e   : > { %p971_p10 = scmp.ne.s32.totalorder %s1252_s17, %s970_s8  ;;  %s975_s11 = sshll.u32 %s1100_s30, 4  ;;  %s976_s11 = int_to_ptr.vmem [resolvable:$false] %s975_s11 }
  0x4f   : > { %s977_s12 = scalar_lea.vmem %s976_s11, 2048  ;;  %p978_p2 = scmp.lt.s32.totalorder %s1252_s17, %s976_s11 }
  0x50   : > { %p973_p11 = pnand %p971_p10, %p957_p3  ;;  %p979_p5 = scmp.lt.s32.totalorder %s977_s12, %s970_s8 }
  0x52   : > { %p974_p13 = pneg %p973_p11  ;;  %p980_p8 = por %p979_p5, %p978_p2 }
  0x54   : > { %p981_p9 = pnand %p980_p8, %p974_p13 }
  0x56   : > { %984 = shalt.err (!%p981_p9)
}
  0x57   : > { %s1415_s22 = smov 4   ;;  %s1416_s23 = smov 64  }
  0x58   : > { %825 = dma.hbm_to_vmem [thread:$0]  (!%p1263_p0), %s1257_s29, 1024, %s1252_s17, %s1267_s13, %s1416_s23, %s1416_s23, %s1415_s22  }
  0x59   : > { %p1417_p3 = scmp.ne.s32.totalorder %s1409_s28, 0 }
  0x5a   : > { %s179_s5 = sand.u32 (!%p1417_p3), 1, %s1079_s18   ;;  %p1418_p7 = scmp.ne.s32.totalorder (!%p1417_p3), %s1405_s25, 0 }
  0x5b   : > { %177 = sbr.rel (%p1417_p3) target bundleno = 375 (0x177), region = 28  ;;  %s642_s2 = sshll.u32 (!%p1417_p3), %s179_s5, 6 }
  0x5c   : > { %s180_s14 = scalar_lea.sflag (!%p1417_p3), [#allocation5], %s179_s5  ;;  %s1301_s27 = scalar_lea.vmem (!%p1417_p3), [#allocation4], %s642_s2 }
  0x62   : > { %1050 = dma.done.wait (%p1418_p7), %s180_s14, 1024  }
  0x63   : > { %1052 = vsyncadd (%p1418_p7), %s180_s14, 4294966272  ;;  %p1419_p12 = scmp.ne.s32.totalorder %s1404_s24, 0 }
  0x65   : > { %1054 = dma.done.wait (%p1419_p12), [#allocation8], 1024  }
  0x66   : > { %1056 = vsyncadd (%p1419_p12), [#allocation8], 4294966272  ;;  %v911_v0 = vld [vmem:[#allocation7] sm:$0xff]   ;;  %v912_v1 = vld [vmem:[#allocation7 + $0x8] sm:$0xff]   ;;  %s205_s24 = sand.u32 1, %s1067_s15   ;;  %s698_s29 = sshll.u32 %s1087_s20, 10 }
  0x67   : > { %762 = vmatprep.subr.bf16.mxu0 %v911_v0  ;;  %794 = vmatprep.subr.bf16.mxu1 %v911_v0  ;;  %v913_v2 = vld [vmem:[#allocation7 + $0x10] sm:$0xff]   ;;  %v914_v3 = vld [vmem:[#allocation7 + $0x18] sm:$0xff]   ;;  %v919_v4 = vld [vmem:[%s1301_s27] sm:$0xff]   ;;  %s644_s25 = sshll.u32 %s205_s24, 6  ;;  %s1328_s4 = scalar_lea.hbm %s1391_s3, %s698_s29 }
  0x68   : > { %763 = vmatpush3.bf16.msra.mxu0 %v911_v0  ;;  %802 = vmatpush3.bf16.msra.mxu1 %v911_v0  ;;  %v920_v5 = vld [vmem:[%s1301_s27 + $0x20] sm:$0xff]   ;;  %v916_v7 = vld [vmem:[#allocation7 + $0x28] sm:$0xff]   ;;  %v917_v8 = vld [vmem:[#allocation7 + $0x30] sm:$0xff]   ;;  %s207_s28 = scalar_lea.vmem [#allocation9], %s644_s25  ;;  %s1332_s20 = scalar_lea.sflag [#allocation6], %s205_s24 }
  0x69   : > { %764 = vmatprep.subr.bf16.mxu0 %v912_v1  ;;  %795 = vmatprep.subr.bf16.mxu1 %v912_v1  ;;  %v915_v6 = vld [vmem:[#allocation7 + $0x20] sm:$0xff]   ;;  %v918_v9 = vld [vmem:[#allocation7 + $0x38] sm:$0xff]   ;;  %v921_v10 = vld [vmem:[%s1301_s27 + $0x8] sm:$0xff]   ;;  %s533_s17 = sshll.u32 %s207_s28, 4  ;;  %p1420_p1 = scmp.ne.s32.totalorder %s1406_s26, 0  ;;  %s1323_s17 = int_to_ptr.vmem [resolvable:$true] %s533_s17 }
  0x6a   : > { %778 = vmatprep.mubr.bf16.mxu0 %v919_v4  ;;  %786 = vmatprep.mubr.bf16.mxu1 %v920_v5  ;;  %v922_v11 = vld [vmem:[%s1301_s27 + $0x28] sm:$0xff]   ;;  %v923_v12 = vld [vmem:[%s1301_s27 + $0x10] sm:$0xff]   ;;  %v925_v14 = vld [vmem:[%s1301_s27 + $0x18] sm:$0xff]   ;;  %s985_s7 = scalar_lea.vmem %s1323_s17, 1024  ;;  %s1101_s8 = smov [#allocation9]  }
  0x6b   : > { %v924_v13 = vld [vmem:[%s1301_s27 + $0x30] sm:$0xff]   ;;  %v926_v15 = vld [vmem:[%s1301_s27 + $0x38] sm:$0xff]   ;;  %p986_p0 = scmp.ne.s32.totalorder %s1323_s17, %s985_s7  ;;  %s989_s30 = sshll.u32 %s1101_s8, 4  ;;  %s990_s30 = int_to_ptr.vmem [resolvable:$false] %s989_s30 }
  0x6c   : > { %765 = vmatpush3.bf16.msra.mxu0 %v912_v1  ;;  %803 = vmatpush3.bf16.msra.mxu1 %v912_v1  ;;  %s991_s11 = scalar_lea.vmem %s990_s30, 2048  ;;  %p992_p10 = scmp.lt.s32.totalorder %s1323_s17, %s990_s30 }
  0x6d   : > { %766 = vmatprep.subr.bf16.mxu0 %v913_v2  ;;  %796 = vmatprep.subr.bf16.mxu1 %v913_v2  ;;  %p987_p4 = pnand %p986_p0, %p1420_p1  ;;  %p993_p11 = scmp.lt.s32.totalorder %s991_s11, %s985_s7 }
  0x6f   : > { %p988_p6 = pneg %p987_p4  ;;  %p994_p13 = por %p993_p11, %p992_p10 }
  0x70   : > { %767 = vmatpush3.bf16.msra.mxu0 %v913_v2  ;;  %804 = vmatpush3.bf16.msra.mxu1 %v913_v2 }
  0x71   : > { %768 = vmatprep.subr.bf16.mxu0 %v914_v3  ;;  %797 = vmatprep.subr.bf16.mxu1 %v914_v3  ;;  %p995_p2 = pnand %p994_p13, %p988_p6 }
  0x74   : > { %769 = vmatpush3.bf16.msra.mxu0 %v914_v3  ;;  %805 = vmatpush3.bf16.msra.mxu1 %v914_v3 }
  0x75   : > { %770 = vmatprep.subr.bf16.mxu0 %v915_v6  ;;  %798 = vmatprep.subr.bf16.mxu1 %v915_v6 }
  0x78   : > { %771 = vmatpush3.bf16.msra.mxu0 %v915_v6  ;;  %806 = vmatpush3.bf16.msra.mxu1 %v915_v6 }
  0x79   : > { %772 = vmatprep.subr.bf16.mxu0 %v916_v7  ;;  %799 = vmatprep.subr.bf16.mxu1 %v916_v7 }
  0x7c   : > { %773 = vmatpush3.bf16.msra.mxu0 %v916_v7  ;;  %807 = vmatpush3.bf16.msra.mxu1 %v916_v7 }
  0x7d   : > { %774 = vmatprep.subr.bf16.mxu0 %v917_v8  ;;  %800 = vmatprep.subr.bf16.mxu1 %v917_v8 }
  0x80   : > { %775 = vmatpush3.bf16.msra.mxu0 %v917_v8  ;;  %808 = vmatpush3.bf16.msra.mxu1 %v917_v8 }
  0x81   : > { %776 = vmatprep.subr.bf16.mxu0 %v918_v9  ;;  %801 = vmatprep.subr.bf16.mxu1 %v918_v9 }
  0x84   : > { %777 = vmatpush3.bf16.msra.mxu0 %v918_v9  ;;  %809 = vmatpush3.bf16.msra.mxu1 %v918_v9 }
  0x87   : > { %779 = vmatmul.mubr.bf16.vlgmr.msra.gmra.mrb[0].mxu0 %v921_v10  ;;  %787 = vmatmul.mubr.bf16.vlgmr.msra.gmra.mrb[0].mxu1 %v922_v11 }
  0x88   : > { %782 = vmatprep.mubr.bf16.mxu0 %v923_v12  ;;  %790 = vmatprep.mubr.bf16.mxu1 %v924_v13 }
  0x8f   : > { %783 = vmatmul.mubr.bf16.gmra.mrb[4].mxu0 %v925_v14  ;;  %791 = vmatmul.mubr.bf16.gmra.mrb[4].mxu1 %v926_v15 }
 0x15a   : > { %v780_v16 = vpop.f32.mrb[0].mxu0  ;;  %v788_v17 = vpop.f32.mrb[0].mxu1 }
 0x15b   : > { %v374_v18 = vpop.f32.mrb[1].mxu0  ;;  %v406_v19 = vpop.f32.mrb[1].mxu1 }
 0x15c   : > { %v781_v20 = vpop.f32.mrb[2].mxu0  ;;  %v789_v21 = vpop.f32.mrb[2].mxu1 }
 0x15d   : > { %v707_v22 = vpack.c.bf16 %v781_v20, %v780_v16  ;;  %v727_v23 = vpack.c.bf16 %v789_v21, %v788_v17  ;;  %v377_v24 = vpop.f32.mrb[3].mxu0  ;;  %v409_v25 = vpop.f32.mrb[3].mxu1 }
 0x15e   : > { %v702_v26 = vpack.c.bf16 %v377_v24, %v374_v18  ;;  %v722_v27 = vpack.c.bf16 %v409_v25, %v406_v19 }
 0x15f   : > { %739 = vst [vmem:[%s207_s28 + $0x8] sm:$0xff] %v707_v22   ;;  %743 = vst [vmem:[%s207_s28 + $0x28] sm:$0xff] %v727_v23  }
 0x160   : > { %703 = vst [vmem:[%s207_s28] sm:$0xff] %v702_v26   ;;  %742 = vst [vmem:[%s207_s28 + $0x20] sm:$0xff] %v722_v27  }
 0x162   : > { %v784_v28 = vpop.f32.mrb[4].mxu0  ;;  %v792_v29 = vpop.f32.mrb[4].mxu1 }
 0x163   : > { %v390_v30 = vpop.f32.mrb[5].mxu0  ;;  %v422_v31 = vpop.f32.mrb[5].mxu1 }
 0x164   : > { %v785_v32 = vpop.f32.mrb[6].mxu0  ;;  %v793_v33 = vpop.f32.mrb[6].mxu1 }
 0x165   : > { %v717_v34 = vpack.c.bf16 %v785_v32, %v784_v28  ;;  %v737_v35 = vpack.c.bf16 %v793_v33, %v792_v29  ;;  %v393_v36 = vpop.f32.mrb[7].mxu0  ;;  %v425_v37 = vpop.f32.mrb[7].mxu1 }
 0x166   : > { %v712_v38 = vpack.c.bf16 %v393_v36, %v390_v30  ;;  %v732_v39 = vpack.c.bf16 %v425_v37, %v422_v31 }
 0x167   : > { %741 = vst [vmem:[%s207_s28 + $0x18] sm:$0xff] %v717_v34   ;;  %745 = vst [vmem:[%s207_s28 + $0x38] sm:$0xff] %v737_v35  }
 0x168   : > { %740 = vst [vmem:[%s207_s28 + $0x10] sm:$0xff] %v712_v38   ;;  %744 = vst [vmem:[%s207_s28 + $0x30] sm:$0xff] %v732_v39  }
 0x169   : > { %998 = shalt.err (!%p995_p2)
}
 0x16a   : > { %s999_s12 = scalar_lea.hbm %s1328_s4, 1024  ;;  %s1003_s5 = scalar_lea.hbm %s1391_s3, 2048 }
 0x16b   : > { %p1000_p5 = scmp.ne.s32.totalorder %s1328_s4, %s999_s12  ;;  %p1004_p3 = scmp.lt.u32.totalorder %s1328_s4, %s1391_s3 }
 0x16c   : > { %p1005_p7 = scmp.lt.u32.totalorder %s1003_s5, %s999_s12  ;;  %p1007_p0 = scmp.lt.u32.totalorder %s999_s12, %s1328_s4 }
 0x16d   : > { %p1001_p8 = pnand %p1000_p5, %p1420_p1 }
 0x16e   : > { %p1006_p12 = por %p1005_p7, %p1004_p3 }
 0x16f   : > { %p1002_p9 = pneg %p1001_p8 }
 0x170   : > { %p1008_p4 = por %p1007_p0, %p1006_p12 }
 0x172   : > { %p1009_p6 = pnand %p1008_p4, %p1002_p9 }
 0x174   : > { %1012 = shalt.err (!%p1009_p6)
}
 0x175   : > { %s1102_s27 = smov 64   ;;  %s1103_s24 = smov 4  }
 0x176   : > { %816 = dma.vmem_to_hbm [thread:$0]  (%p1420_p1), %s1323_s17, 1024, %s1328_s4, %s1332_s20, %s1102_s27, %s1102_s27, %s1103_s24  }
 0x177 PF: > { %s1421_s25 = sld [smem:[#allocation13_spill]]  ;;  %s1422_s28 = sld [smem:[#allocation14_spill]] }
 0x178   : > { %p1424_p11 = scmp.ge.s32.totalorder %s1095_s21, 2 }
 0x17d   : > { %s548_s29 = sand.u32 1, %s1421_s25   ;;  %p1423_p10 = scmp.ne.s32.totalorder %s1422_s28, 0 }
 0x17e   : > { %s549_s6 = scalar_lea.sflag [#allocation6], %s548_s29 }
 0x17f   : > { %p827_p13 = pnand %p1424_p11, %p1423_p10 }
 0x181   : > { %1058 = dma.done.wait (!%p827_p13), %s549_s6, 1024  }
 0x182   : > { %1060 = vsyncadd (!%p827_p13), %s549_s6, 4294966272  ;;  %s21_s21 = sadd.s32 1, %s1095_s21   ;;  %s1425_s26 = sld [smem:[#allocation15_spill]] }
 0x183   : > { %p18_p2 = scmp.ge.s32.totalorder %s21_s21, 4   ;;  %s1426_s14 = smov %s1067_s15 }
 0x184   : > { %s1427_s15 = smov %s1071_s16  ;;  %s1428_s16 = smov %s1246_s9 }
 0x185   : > { %s1429_s17 = smov %s1079_s18  ;;  %s1430_s18 = smov %s1083_s19 }
 0x186   : > { %s1431_s19 = smov %s1249_s10  ;;  %s1432_s20 = smov %s1091_s0 }
 0x187   :  { %20 = sbr.rel (!%p18_p2) target bundleno = 12 (0xc), region = 78 }
 0x188   : > { %s1433_s0 = smov %s1425_s26 }
 0x18e   :  { %554 = vsyncpa [#allocation5], 1 }
 0x18f   :  { %556 = vsyncpa [#allocation5 + $0x1], 1 }
 0x190   :  { %557 = vsyncpa [#allocation8], 1 }
 0x191   :  { %558 = vsyncpa [#allocation6], 1 }
 0x192   :  { %560 = vsyncpa [#allocation6 + $0x1], 1 }

</bundles_post_ra>
